<compile_context>
chip_gen: v7x
topology: tpu7x:2x2x1
jax: 0.10.0
libtpu: 0.0.40
codegen_flags: <defaults>
</compile_context>

<pallas_src>
import functools

import jax
import jax.numpy as jnp
from jax.experimental import pallas as pl
from jax.experimental.pallas import tpu as pltpu


def _round_up(n, m):
    return ((n + m - 1) // m) * m


def _make_rmsnorm_kernel(eps: float, d: int):
    inv_d = 1.0 / float(d)

    def kernel(x_ref, gain_ref, o_ref):
        # x_ref: (rows_tile, D) tile in VMEM; gain_ref: (1, D).
        x = x_ref[...]
        # Reduction in f32 for accuracy.
        xf = x.astype(jnp.float32)
        ms = jnp.sum(xf * xf, axis=-1, keepdims=True) * inv_d + eps
        inv_rms = jax.lax.rsqrt(ms)  # EUP rsqrt, per row
        # Broadcast multiply stays in the I/O dtype (bf16 stays bf16):
        # halves the (rows_tile, D) intermediate footprint vs an f32 path.
        out = (x * inv_rms.astype(x.dtype)) * gain_ref[...].astype(x.dtype)
        o_ref[...] = out.astype(o_ref.dtype)

    return kernel


@functools.partial(jax.jit, static_argnames=("eps", "rows_tile"))
def rmsnorm(x, gain, eps: float = 1e-5, rows_tile: int | None = None):
    """RMSNorm over the last axis. x: (..., d_model); gain: (d_model,)."""
    orig_shape = x.shape
    d = orig_shape[-1]
    n_rows = 1
    for s in orig_shape[:-1]:
        n_rows *= int(s)

    x2d = x.reshape(n_rows, d)
    gain2d = gain.reshape(1, d)

    # Sublane multiple: 8 rows for 32-bit dtypes, 16 for bf16.
    row_mult = 16 if x.dtype == jnp.bfloat16 else 8

    if rows_tile is None:
        # ~512-row tiles: measured sweet spot (~85% of HBM roofline) while
        # each double-buffered in+out tile stays well under scoped VMEM on
        # all of v5e/v6e/v7x for realistic d_model.
        rows_tile = min(512, _round_up(max(n_rows, 1), row_mult))
    rows_tile = max(row_mult, (rows_tile // row_mult) * row_mult)

    # Handle n_rows not divisible by rows_tile: pad rows (zero rows are
    # well-defined under RMSNorm and are sliced off afterwards).
    padded_rows = _round_up(n_rows, rows_tile)
    if padded_rows != n_rows:
        x2d = jnp.pad(x2d, ((0, padded_rows - n_rows), (0, 0)))

    grid = (padded_rows // rows_tile,)

    itemsize = jnp.dtype(x.dtype).itemsize
    cost = pl.CostEstimate(
        flops=3 * n_rows * d,              # square, scale, gain
        transcendentals=n_rows,            # one rsqrt per row
        bytes_accessed=2 * n_rows * d * itemsize + d * itemsize,
    )

    kernel = _make_rmsnorm_kernel(float(eps), d)

    out2d = pl.pallas_call(
        kernel,
        out_shape=jax.ShapeDtypeStruct((padded_rows, d), x.dtype),
        grid_spec=pltpu.PrefetchScalarGridSpec(
            num_scalar_prefetch=0,
            grid=grid,
            in_specs=[
                pl.BlockSpec((rows_tile, d), lambda i: (i, 0)),
                pl.BlockSpec((1, d), lambda i: (0, 0)),
            ],
            # Keep output lane-dense: never block along d.
            out_specs=pl.BlockSpec((rows_tile, d), lambda i: (i, 0)),
        ),
        compiler_params=pltpu.CompilerParams(
            dimension_semantics=("parallel",),   # rows shard across v7x's 2 TCs
            vmem_limit_bytes=48 << 20,           # clears 16/32 MiB scoped defaults,
                                                 # headroom under v7x 64 MiB physical
        ),
        cost_estimate=cost,
    )(x2d, gain2d)

    if padded_rows != n_rows:
        out2d = out2d[:n_rows]
    return out2d.reshape(orig_shape)


def rmsnorm_reference(x, gain, eps=1e-5):
    d = x.shape[-1]
    xf = x.astype(jnp.float32)
    rms = jnp.sqrt(jnp.sum(xf * xf, axis=-1, keepdims=True) / d + eps)
    return ((xf / rms) * gain.astype(jnp.float32)).astype(x.dtype)


if __name__ == "__main__":
    key = jax.random.PRNGKey(0)

    # Primary test: matches the PyTorch module's (batch, seq, d_model) layout.
    batch, seq, d_model = 2, 8, 32
    x = jax.random.normal(key, (batch, seq, d_model), dtype=jnp.float32)
    gain = jnp.ones((d_model,), dtype=jnp.float32)  # nn.Parameter(torch.ones(d_model))

    out = rmsnorm(x, gain, eps=1e-5)
    out = jax.block_until_ready(out)
    ref = rmsnorm_reference(x, gain, eps=1e-5)
    assert out.shape == x.shape and out.dtype == x.dtype
    assert jnp.allclose(out, ref, atol=1e-5, rtol=1e-5)

    # Secondary test: ragged row count + multi-step grid (exercises padding
    # and the pipelined path with a fixed tile smaller than n_rows).
    key2 = jax.random.PRNGKey(1)
    x2 = jax.random.normal(key2, (3, 7, 128), dtype=jnp.float32)
    gain2 = jax.random.normal(jax.random.PRNGKey(2), (128,), dtype=jnp.float32)
    out2 = jax.block_until_ready(rmsnorm(x2, gain2, eps=1e-5, rows_tile=8))
    ref2 = rmsnorm_reference(x2, gain2, eps=1e-5)
    assert out2.shape == x2.shape and out2.dtype == x2.dtype
    assert jnp.allclose(out2, ref2, atol=1e-5, rtol=1e-5)

    print("KERNEL_OK")
</pallas_src>

<mosaic_0001>
module attributes {stable_mosaic.version = 11 : i64} {
  func.func @kernel(%arg0: i32, %arg1: memref<16x32xf32, #tpu.memory_space<vmem>>, %arg2: memref<1x32xf32, #tpu.memory_space<vmem>>, %arg3: memref<16x32xf32, #tpu.memory_space<vmem>>) attributes {dimension_semantics = [#tpu.dimension_semantics<parallel>], iteration_bounds = array<i64: 1>, scalar_prefetch = 0 : i64, scratch_operands = 0 : i64, tpu.core_type = #tpu.core_type<tc>, window_params = [{transform_indices = @transform_0, window_bounds = array<i64: 16, 32>}, {pipeline_mode = #tpu.pipeline_mode<synchronous>, transform_indices = @transform_1, window_bounds = array<i64: 1, 32>}, {transform_indices = @transform_2, window_bounds = array<i64: 16, 32>}]} {
    %c0 = arith.constant 0 : index
    %c0_0 = arith.constant 0 : index
    %0 = vector.load %arg1[%c0, %c0_0] : memref<16x32xf32, #tpu.memory_space<vmem>>, vector<16x32xf32>
    %1 = arith.mulf %0, %0 : vector<16x32xf32>
    %cst = arith.constant dense<0.000000e+00> : vector<16xf32>
    %2 = vector.multi_reduction <add>, %1, %cst [1] : vector<16x32xf32> to vector<16xf32>
    %3 = vector.shape_cast %2 : vector<16xf32> to vector<16x1xf32>
    %cst_1 = arith.constant 3.125000e-02 : f32
    %4 = vector.broadcast %cst_1 : f32 to vector<16x1xf32>
    %5 = arith.mulf %3, %4 : vector<16x1xf32>
    %cst_2 = arith.constant 9.99999974E-6 : f32
    %6 = vector.broadcast %cst_2 : f32 to vector<16x1xf32>
    %7 = arith.addf %5, %6 : vector<16x1xf32>
    %8 = math.rsqrt %7 : vector<16x1xf32>
    %9 = vector.broadcast %8 : vector<16x1xf32> to vector<16x32xf32>
    %10 = arith.mulf %0, %9 : vector<16x32xf32>
    %c0_3 = arith.constant 0 : index
    %c0_4 = arith.constant 0 : index
    %11 = vector.load %arg2[%c0_3, %c0_4] : memref<1x32xf32, #tpu.memory_space<vmem>>, vector<1x32xf32>
    %12 = vector.broadcast %11 : vector<1x32xf32> to vector<16x32xf32>
    %13 = arith.mulf %10, %12 : vector<16x32xf32>
    %c0_5 = arith.constant 0 : index
    %c0_6 = arith.constant 0 : index
    %14 = vector.load %arg3[%c0_5, %c0_6] : memref<16x32xf32, #tpu.memory_space<vmem>>, vector<16x32xf32>
    tpu.vector_store %arg3[%c0_5, %c0_6], %13 {strides = array<i32>} : memref<16x32xf32, #tpu.memory_space<vmem>>, vector<16x32xf32>,
    return
  }
  func.func @transform_0(%arg0: i32) -> (i32, i32) {
    %c0_i32 = arith.constant 0 : i32
    %c0_i32_0 = arith.constant 0 : i32
    return %arg0, %c0_i32 : i32, i32
  }
  func.func @transform_1(%arg0: i32) -> (i32, i32) {
    %c0_i32 = arith.constant 0 : i32
    %c0_i32_0 = arith.constant 0 : i32
    %c0_i32_1 = arith.constant 0 : i32
    return %c0_i32, %c0_i32_0 : i32, i32
  }
  func.func @transform_2(%arg0: i32) -> (i32, i32) {
    %c0_i32 = arith.constant 0 : i32
    %c0_i32_0 = arith.constant 0 : i32
    return %arg0, %c0_i32 : i32, i32
  }
}

</mosaic_0001>

<bundles_post_ra>
// kernel: rmsnorm.1
= control target key start
LH: loop header
LB: loop body
LE: loop exit
PB: predicated region body
PF: predicated region fallthrough
CT: control target
= control target key end

     0   :  { %7 = vsyncpa [#allocation3], 0  ;;  %s186_s0 = inlined_call_operand.hbm [shape: f32[16,32], index: 0, kind: input, shape index: {}]   ;;  %s187_s1 = inlined_call_operand.vmem [shape: f32[1,32], index: 1, kind: input, shape index: {}]   ;;  %s188_s2 = inlined_call_operand.hbm [shape: f32[16,32], index: 2, kind: output, shape index: {}]  }
   0x1   :  { %8 = vsyncpa [#allocation4], 0  ;;  %s130_s9 = smov [#allocation2]   ;;  %s82_s13 = scalar_lea.hbm %s186_s0, 256 }
   0x2   :  { %s14_s10 = sshll.u32 %s130_s9, 4  ;;  %p83_p0 = scmp.ne.s32.totalorder %s186_s0, %s82_s13  ;;  %s15_s10 = int_to_ptr.vmem [resolvable:$true] %s14_s10 }
   0x3   :  { %p86_p1 = scmp.lt.u32.totalorder %s82_s13, %s186_s0 }
   0x5   :  { %p88_p2 = pnand %p86_p1, %p83_p0 }
   0x7   :  { %91 = shalt.err (!%p88_p2)
}
   0x8   :  { %s92_s18 = scalar_lea.vmem %s15_s10, 256  ;;  %p97_p4 = scmp.lt.s32.totalorder %s15_s10, %s15_s10 }
   0x9   :  { %p93_p3 = scmp.ne.s32.totalorder %s15_s10, %s92_s18  ;;  %p98_p5 = scmp.lt.s32.totalorder %s92_s18, %s92_s18 }
   0xb   :  { %p99_p6 = por %p98_p5, %p97_p4 }
   0xd   :  { %p100_p7 = pnand %p99_p6, %p93_p3 }
   0xf   :  { %103 = shalt.err (!%p100_p7)
}
  0x10   :  { %s131_s19 = smov 128   ;;  %s132_s20 = smov 8  }
  0x11   :  { %20 = dma.hbm_to_vmem [thread:$0]  %s186_s0, 256, %s15_s10, [#allocation3], %s131_s19, %s131_s19, %s132_s20  }
  0x12   :  { %126 = dma.done.wait [#allocation3], 256  }
  0x13   :  { %127 = vsyncadd [#allocation3], 4294967040  ;;  %v26_v0 = vld [vmem:[#allocation2] sm:$0xff]  ;;  %vm30_vm0 = vcmask 261120   ;;  %v27_v1 = vld [vmem:[#allocation2 + $0x8] sm:$0xff]  ;;  %s133_s24 = smov [#allocation5]  }
  0x14   :  { %v28_v2 = vmul.f32 %v26_v0, %v26_v0  ;;  %v29_v3 = vmul.f32 %v27_v1, %v27_v1  ;;  %v73_v13 = vld [vmem:[%s187_s1] ss:$0 sm:$0xff]  ;;  %s61_s25 = sshll.u32 %s133_s24, 4  ;;  %s62_s25 = int_to_ptr.vmem [resolvable:$true] %s61_s25 }
  0x15   :  { %s104_s26 = scalar_lea.vmem %s62_s25, 256  ;;  %p109_p9 = scmp.lt.s32.totalorder %s62_s25, %s62_s25 }
  0x16   :  { %v31_v4 = vsel %vm30_vm0, %v28_v2, 0.0  ;;  %v34_v5 = vsel %vm30_vm0, %v29_v3, 0.0  ;;  %p105_p8 = scmp.ne.s32.totalorder %s62_s25, %s104_s26  ;;  %p110_p10 = scmp.lt.s32.totalorder %s104_s26, %s104_s26 }
  0x17   :  { %32 = vadd.xlane.f32.xlu0 %v31_v4 }
  0x18   :  { %p111_p11 = por %p110_p10, %p109_p9 }
  0x1a   :  { %p112_p12 = pnand %p111_p11, %p105_p8 }
  0x1b   :  { %35 = vadd.xlane.f32.xlu0 %v34_v5 }
  0xa4   :  { %v33_v6 = vpop.xlane.xlu0 %32 }
  0xa5   :  { %v37_v7 = vmul.f32 0.03125, %v33_v6 }
  0xa7   :  { %v39_v8 = vadd.f32 1e-05, %v37_v7 }
  0xa8   :  { %v36_v9 = vpop.xlane.xlu0 %35 }
  0xa9   :  { %78 = vrsqrt.f32 %v39_v8  ;;  %v38_v10 = vmul.f32 0.03125, %v36_v9 }
  0xab   :  { %v40_v11 = vadd.f32 1e-05, %v38_v10 }
  0xad   :  { %80 = vrsqrt.f32 %v40_v11 }
  0xb3   :  { %v79_v12 = vpop.eup %78 }
  0xb4   :  { %v43_v14 = vmul.f32 %v79_v12, %v26_v0 }
  0xb6   :  { %v52_v15 = vmul.f32 %v73_v13, %v43_v14 }
  0xb7   :  { %v81_v16 = vpop.eup %80 }
  0xb8   :  { %v44_v17 = vmul.f32 %v81_v16, %v27_v1  ;;  %54 = vst.msk [vmem:[#allocation5] sm:$0xff] %vm30_vm0, %v52_v15 }
  0xba   :  { %v53_v18 = vmul.f32 %v73_v13, %v44_v17 }
  0xbc   :  { %55 = vst.msk [vmem:[#allocation5 + $0x8] sm:$0xff] %vm30_vm0, %v53_v18 }
  0xbd   :  { %115 = shalt.err (!%p112_p12)
}
  0xbe   :  { %s116_s28 = scalar_lea.hbm %s188_s2, 256 }
  0xbf   :  { %p117_p13 = scmp.ne.s32.totalorder %s188_s2, %s116_s28  ;;  %p120_p0 = scmp.lt.u32.totalorder %s116_s28, %s188_s2 }
  0xc1   :  { %p122_p1 = pnand %p120_p0, %p117_p13 }
  0xc3   :  { %125 = shalt.err (!%p122_p1)
}
  0xc4   :  { %67 = dma.vmem_to_hbm [thread:$0]  %s62_s25, 256, %s188_s2, [#allocation4], %s131_s19, %s131_s19, %s132_s20  }
  0xc5   :  { %128 = dma.done.wait [#allocation4], 256  }
  0xc6   :  { %129 = vsyncadd [#allocation4], 4294967040 }
  0xc7   :  { %71 = vsyncpa [#allocation3], 1 }
  0xc8   :  { %72 = vsyncpa [#allocation4], 1 }

</bundles_post_ra>
